<compile_context>
chip_gen: v7x
topology: tpu7x:2x2x1
jax: 0.10.0
libtpu: 0.0.40
codegen_flags: <defaults>
</compile_context>

<pallas_src>
import jax
import jax.numpy as jnp
from jax.experimental import pallas as pl
from jax.experimental.pallas import tpu as pltpu


TM = 128  # row-tile size (multiple of 128: lane dim of the P tile, MXU-friendly on all gens)


def _round_up(x, m):
    return ((x + m - 1) // m) * m


def gcn_tile_kernel(a_ref, xw_ref, b_ref, p_ref, o_ref):
    # propagate this row tile: (TM, N_pad) bf16 @ (N_pad, H_pad) bf16 -> f32 accumulate
    h = jnp.dot(a_ref[...], xw_ref[...], preferred_element_type=jnp.float32)
    # bias + relu on the f32 accumulator (padded rows/cols are zeroed out by P / padded bias)
    h = jnp.maximum(h + b_ref[...], 0.0)
    # partial mean pool for this tile's rows: (G_pad, TM) @ (TM, H_pad)
    partial = jnp.dot(p_ref[...], h, preferred_element_type=jnp.float32)
    o_ref[...] = partial[None, :, :]


def molecular_gcn_forward(node_feat, edge_index, batch, weight, bias, num_graphs):
    """GCNConv(add_self_loops, sym-norm) -> relu -> global_mean_pool, hot path in Pallas."""
    node_feat = node_feat.astype(jnp.float32)
    weight = weight.astype(jnp.float32)
    bias = bias.astype(jnp.float32)

    N = node_feat.shape[0]
    H = weight.shape[1]
    G = num_graphs

    N_pad = _round_up(N, TM)
    H_pad = _round_up(H, 128)  # lane-dense hidden width
    G_pad = _round_up(G, 8)    # sublane-dense graph count
    num_tiles = N_pad // TM

    # ---- glue: dense GCN-normalized adjacency with self-loops (scatter build) ----
    src = edge_index[0]
    dst = edge_index[1]
    loops = jnp.arange(N, dtype=edge_index.dtype)
    src = jnp.concatenate([src, loops])
    dst = jnp.concatenate([dst, loops])
    ew = jnp.ones(src.shape[0], dtype=jnp.float32)
    deg = jnp.zeros((N,), jnp.float32).at[dst].add(ew)
    dinv_sqrt = jnp.where(deg > 0.0, jax.lax.rsqrt(deg), 0.0)
    norm = dinv_sqrt[src] * dinv_sqrt[dst] * ew
    a_hat = jnp.zeros((N, N), jnp.float32).at[dst, src].add(norm)
    a_hat = jnp.pad(a_hat, ((0, N_pad - N), (0, N_pad - N))).astype(jnp.bfloat16)

    # ---- glue: precompute XW once (K = F_in is tiny); feed padded bf16 to the kernel ----
    xw = node_feat @ weight                                      # (N, H) f32
    xw = jnp.pad(xw, ((0, N_pad - N), (0, H_pad - H))).astype(jnp.bfloat16)

    b2 = jnp.pad(bias, (0, H_pad - H)).reshape(1, H_pad)         # (1, H_pad) f32

    # ---- glue: mean-pooling matrix from batch assignment (padded rows/cols are zero) ----
    counts = jnp.zeros((G,), jnp.float32).at[batch].add(1.0)
    onehot = (batch[None, :] == jnp.arange(G)[:, None]).astype(jnp.float32)
    p = onehot / jnp.maximum(counts, 1.0)[:, None]               # (G, N)
    p = jnp.pad(p, ((0, G_pad - G), (0, N_pad - N)))             # (G_pad, N_pad) f32

    # explicit VMEM budget (double-buffered tiles), important on v7x (64 MiB physical)
    est = (2 * TM * N_pad * 2          # A_hat tile, bf16, 2 buffers
           + 2 * N_pad * H_pad * 2     # XW, bf16
           + 2 * H_pad * 4             # bias
           + 2 * G_pad * TM * 4        # P tile
           + 2 * G_pad * H_pad * 4)    # output block
    vmem_limit = min(max(2 * est + (1 << 20), 4 << 20), 48 << 20)

    partials = pl.pallas_call(
        gcn_tile_kernel,
        out_shape=jax.ShapeDtypeStruct((num_tiles, G_pad, H_pad), jnp.float32),
        grid=(num_tiles,),
        in_specs=[
            pl.BlockSpec((TM, N_pad), lambda i: (i, 0)),      # A_hat row tile (pipelined stream)
            pl.BlockSpec((N_pad, H_pad), lambda i: (0, 0)),   # XW, resident across tiles
            pl.BlockSpec((1, H_pad), lambda i: (0, 0)),       # bias
            pl.BlockSpec((G_pad, TM), lambda i: (0, i)),      # pooling columns for this tile
        ],
        out_specs=pl.BlockSpec((1, G_pad, H_pad), lambda i: (i, 0, 0)),
        compiler_params=pltpu.CompilerParams(
            dimension_semantics=("parallel",),                # megacore-shardable on v7x
            vmem_limit_bytes=vmem_limit),
    )(a_hat, xw, b2, p)

    # tiny reduction over per-tile partial pools, then strip padding
    return partials.sum(axis=0)[:G, :H]


def reference_forward(node_feat, edge_index, batch, weight, bias, num_graphs):
    """Pure-JAX full-precision reference for correctness check."""
    N = node_feat.shape[0]
    src = edge_index[0]
    dst = edge_index[1]
    loops = jnp.arange(N, dtype=edge_index.dtype)
    src = jnp.concatenate([src, loops])
    dst = jnp.concatenate([dst, loops])
    ew = jnp.ones(src.shape[0], dtype=jnp.float32)
    deg = jnp.zeros((N,), jnp.float32).at[dst].add(ew)
    dinv = jnp.where(deg > 0.0, jax.lax.rsqrt(deg), 0.0)
    norm = dinv[src] * dinv[dst] * ew
    a_hat = jnp.zeros((N, N), jnp.float32).at[dst, src].add(norm)
    h = jnp.maximum(a_hat @ (node_feat @ weight) + bias[None, :], 0.0)
    counts = jnp.zeros((num_graphs,), jnp.float32).at[batch].add(1.0)
    onehot = (batch[None, :] == jnp.arange(num_graphs)[:, None]).astype(jnp.float32)
    p = onehot / jnp.maximum(counts, 1.0)[:, None]
    return p @ h


if __name__ == "__main__":
    # 2 graphs, 80-node rings each (N=160 -> 2 row tiles of 128 after padding), 8 in-feats, 32 hidden.
    key = jax.random.PRNGKey(0)
    k_x, k_w, _ = jax.random.split(key, 3)

    NODES_PER_GRAPH = 80
    G = 2
    N = G * NODES_PER_GRAPH
    F_IN = 8
    HID = 32

    node_feat = jax.random.normal(k_x, (N, F_IN), dtype=jnp.float32)

    # Undirected ring within each graph (edges given in both directions).
    edges = []
    for g in range(G):
        base = g * NODES_PER_GRAPH
        for i in range(NODES_PER_GRAPH):
            a, b = base + i, base + (i + 1) % NODES_PER_GRAPH
            edges.append((a, b))
            edges.append((b, a))
    edge_index = jnp.array(edges, dtype=jnp.int32).T                 # (2, E)
    batch = jnp.array(sum([[g] * NODES_PER_GRAPH for g in range(G)], []),
                      dtype=jnp.int32)                               # (N,)

    # Deterministic parameter init (GCNConv: Linear(F_IN, HID).weight^T, plus bias).
    glorot = (6.0 / (F_IN + HID)) ** 0.5
    weight = jax.random.uniform(k_w, (F_IN, HID), minval=-glorot, maxval=glorot,
                                dtype=jnp.float32)
    bias = jnp.zeros((HID,), dtype=jnp.float32)

    out = molecular_gcn_forward(node_feat, edge_index, batch, weight, bias, G)
    out = jax.block_until_ready(out)

    ref = reference_forward(node_feat, edge_index, batch, weight, bias, G)
    assert out.shape == (G, HID)
    # bf16 inputs with f32 accumulation -> compare against the f32 reference with bf16-level tol.
    assert jnp.allclose(out, ref, atol=2e-2, rtol=2e-2), \
        f"max abs err {jnp.max(jnp.abs(out - ref))}"

    print("KERNEL_OK")
</pallas_src>

<mosaic_0001>
module attributes {stable_mosaic.version = 11 : i64} {
  func.func @gcn_tile_kernel(%arg0: i32, %arg1: memref<128x256xbf16, #tpu.memory_space<vmem>>, %arg2: memref<256x128xbf16, #tpu.memory_space<vmem>>, %arg3: memref<1x128xf32, #tpu.memory_space<vmem>>, %arg4: memref<8x128xf32, #tpu.memory_space<vmem>>, %arg5: memref<1x8x128xf32, #tpu.memory_space<vmem>>) attributes {dimension_semantics = [#tpu.dimension_semantics<parallel>], iteration_bounds = array<i64: 2>, scalar_prefetch = 0 : i64, scratch_operands = 0 : i64, tpu.core_type = #tpu.core_type<tc>, window_params = [{transform_indices = @transform_0, window_bounds = array<i64: 128, 256>}, {pipeline_mode = #tpu.pipeline_mode<synchronous>, transform_indices = @transform_1, window_bounds = array<i64: 256, 128>}, {pipeline_mode = #tpu.pipeline_mode<synchronous>, transform_indices = @transform_2, window_bounds = array<i64: 1, 128>}, {transform_indices = @transform_3, window_bounds = array<i64: 8, 128>}, {transform_indices = @transform_4, window_bounds = array<i64: 1, 8, 128>}]} {
    %c0 = arith.constant 0 : index
    %c0_0 = arith.constant 0 : index
    %0 = vector.load %arg1[%c0, %c0_0] : memref<128x256xbf16, #tpu.memory_space<vmem>>, vector<128x256xbf16>
    %c0_1 = arith.constant 0 : index
    %c0_2 = arith.constant 0 : index
    %1 = vector.load %arg2[%c0_1, %c0_2] : memref<256x128xbf16, #tpu.memory_space<vmem>>, vector<256x128xbf16>
    %cst = arith.constant dense<0.000000e+00> : vector<128x128xf32>
    %2 = tpu.matmul %0, %1, %cst {dimension_numbers = #tpu.dot_dimension_numbers<[1], [0], [0], [1], [0, 0, 1, 1], [], []>} : vector<128x256xbf16>, vector<256x128xbf16>, vector<128x128xf32> -> vector<128x128xf32>
    %c0_3 = arith.constant 0 : index
    %c0_4 = arith.constant 0 : index
    %3 = vector.load %arg3[%c0_3, %c0_4] : memref<1x128xf32, #tpu.memory_space<vmem>>, vector<1x128xf32>
    %4 = vector.broadcast %3 : vector<1x128xf32> to vector<128x128xf32>
    %5 = arith.addf %2, %4 : vector<128x128xf32>
    %cst_5 = arith.constant 0.000000e+00 : f32
    %6 = vector.broadcast %cst_5 : f32 to vector<128x128xf32>
    %7 = arith.maximumf %5, %6 : vector<128x128xf32>
    %c0_6 = arith.constant 0 : index
    %c0_7 = arith.constant 0 : index
    %8 = vector.load %arg4[%c0_6, %c0_7] : memref<8x128xf32, #tpu.memory_space<vmem>>, vector<8x128xf32>
    %cst_8 = arith.constant dense<0.000000e+00> : vector<8x128xf32>
    %9 = tpu.matmul %8, %7, %cst_8 {dimension_numbers = #tpu.dot_dimension_numbers<[1], [0], [0], [1], [0, 0, 1, 1], [], []>} : vector<8x128xf32>, vector<128x128xf32>, vector<8x128xf32> -> vector<8x128xf32>
    %10 = vector.shape_cast %9 : vector<8x128xf32> to vector<1x8x128xf32>
    %c0_9 = arith.constant 0 : index
    %c0_10 = arith.constant 0 : index
    %c0_11 = arith.constant 0 : index
    %11 = vector.load %arg5[%c0_9, %c0_10, %c0_11] : memref<1x8x128xf32, #tpu.memory_space<vmem>>, vector<1x8x128xf32>
    tpu.vector_store %arg5[%c0_9, %c0_10, %c0_11], %10 {strides = array<i32>} : memref<1x8x128xf32, #tpu.memory_space<vmem>>, vector<1x8x128xf32>,
    return
  }
  func.func @transform_0(%arg0: i32) -> (i32, i32) {
    %c0_i32 = arith.constant 0 : i32
    %c0_i32_0 = arith.constant 0 : i32
    return %arg0, %c0_i32 : i32, i32
  }
  func.func @transform_1(%arg0: i32) -> (i32, i32) {
    %c0_i32 = arith.constant 0 : i32
    %c0_i32_0 = arith.constant 0 : i32
    %c0_i32_1 = arith.constant 0 : i32
    return %c0_i32, %c0_i32_0 : i32, i32
  }
  func.func @transform_2(%arg0: i32) -> (i32, i32) {
    %c0_i32 = arith.constant 0 : i32
    %c0_i32_0 = arith.constant 0 : i32
    %c0_i32_1 = arith.constant 0 : i32
    return %c0_i32, %c0_i32_0 : i32, i32
  }
  func.func @transform_3(%arg0: i32) -> (i32, i32) {
    %c0_i32 = arith.constant 0 : i32
    %c0_i32_0 = arith.constant 0 : i32
    return %c0_i32, %arg0 : i32, i32
  }
  func.func @transform_4(%arg0: i32) -> (i32, i32, i32) {
    %c0_i32 = arith.constant 0 : i32
    %c0_i32_0 = arith.constant 0 : i32
    %c0_i32_1 = arith.constant 0 : i32
    return %arg0, %c0_i32, %c0_i32_0 : i32, i32, i32
  }
}

</mosaic_0001>

<bundles_post_ra>
// kernel: tpu_custom_call.1
= control target key start
LH: loop header
LB: loop body
LE: loop exit
PB: predicated region body
PF: predicated region fallthrough
CT: control target
= control target key end

     0   :  { %s1619_s0 = inlined_call_operand.hbm [shape: bf16[256,256], index: 0, kind: input, shape index: {}]   ;;  %s1620_s1 = inlined_call_operand.hbm [shape: bf16[256,128], index: 1, kind: input, shape index: {}]   ;;  %s1621_s2 = inlined_call_operand.vmem [shape: f32[1,128], index: 2, kind: input, shape index: {}]   ;;  %s1622_s3 = inlined_call_operand.hbm [shape: f32[8,256], index: 3, kind: input, shape index: {}]   ;;  %s1623_s4 = inlined_call_operand.hbm [shape: f32[2,8,128], index: 4, kind: output, shape index: {}]  }
   0x1   :  { %1631 = sst [smem:[#allocation13_spill]] %s1619_s0 }
   0x2   :  { %9 = vsyncpa [#allocation3], 0 }
   0x3   :  { %11 = vsyncpa [#allocation3 + $0x1], 0 }
   0x4   :  { %12 = vsyncpa [#allocation6], 0 }
   0x5   :  { %13 = vsyncpa [#allocation4], 0 }
   0x6   :  { %15 = vsyncpa [#allocation4 + $0x1], 0  ;;  %s1317_s15 = smov 0   ;;  %s1319_s16 = smov 0  }
   0x7   :  { %s1321_s17 = smov 0   ;;  %s1323_s18 = smov 0  }
   0x8 LB: > { %s1338_s19 = sadd.s32 1, %s1279_s18   ;;  %s28_s20 = sadd.s32 1, %s1275_s17  ;;  %s1279_s18 = sphi %s1323_s18, %s1652_s18   ;;  %s1275_s17 = sphi %s1321_s17, %s1651_s17   ;;  %s1271_s16 = sphi %s1319_s16, %s1650_s16   ;;  %s1267_s15 = sphi %s1317_s15, %s1649_s15  }
   0x9   : > { %s25_s21 = ssub.s32 %s1279_s18, %s1338_s19  ;;  %p35_p0 = scmp.ne.s32.totalorder %s1275_s17, %s1271_s16 }
   0xa   : > { %p26_p1 = scmp.eq.s32.totalorder %s25_s21, 0  ;;  %p36_p2 = scmp.eq.s32.totalorder %s1279_s18, 0 }
   0xb   : > { %p1034_p4 = scmp.lt.s32.totalorder %s1279_s18, 2  ;;  %s175_s23 = sand.u32 1, %s1279_s18  }
   0xc   : > { %s1349_s22 = scalar_select %p26_p1, %s1275_s17, %s28_s20  }
   0xd   : > { %p37_p5 = por %p36_p2, %p35_p0  ;;  %s177_s24 = sand.u32 1, %s1275_s17  }
   0xe   : > { %s802_s25 = sshll.u32 %s177_s24, 7  ;;  %s851_s26 = sshll.u32 %s1279_s18, 11 }
   0xf   : > { %s1632_s0 = sld [smem:[#allocation13_spill]]  ;;  %s179_s30 = scalar_lea.vmem [#allocation2], %s802_s25 }
  0x10   : > { %s187_s5 = sshll.u32 %s179_s30, 4  ;;  %p1364_p6 = pnand %p1034_p4, %p37_p5  ;;  %s1368_s5 = int_to_ptr.vmem [resolvable:$true] %s187_s5 }
  0x11   : > { %s1370_s7 = scalar_lea.sflag [#allocation3], %s175_s23 }
  0x12   : > { %s1633_s6 = scalar_select %p1364_p6, 1, 0 }
  0x13   : > { %p1625_p8 = pneg %p1364_p6 }
  0x15   : > { %s1362_s29 = scalar_lea.hbm %s1632_s0, %s851_s26  ;;  %s1122_s11 = scalar_lea.hbm %s1632_s0, 4096 }
  0x16   : > { %s1117_s8 = scalar_lea.hbm %s1362_s29, 2048  ;;  %p1123_p11 = scmp.lt.u32.totalorder %s1362_s29, %s1632_s0 }
  0x17   : > { %p1118_p7 = scmp.ne.s32.totalorder %s1362_s29, %s1117_s8  ;;  %p1124_p12 = scmp.lt.u32.totalorder %s1122_s11, %s1117_s8 }
  0x18   : > { %p1126_p1 = scmp.lt.u32.totalorder %s1117_s8, %s1362_s29 }
  0x19   : > { %p1120_p9 = pnand %p1625_p8, %p1118_p7  ;;  %p1125_p13 = por %p1124_p12, %p1123_p11 }
  0x1b   : > { %p1121_p10 = pneg %p1120_p9  ;;  %p1127_p2 = por %p1126_p1, %p1125_p13 }
  0x1d   : > { %p1128_p4 = pnand %p1127_p2, %p1121_p10 }
  0x1f   : > { %1131 = shalt.err (!%p1128_p4)
}
  0x20   : > { %s1132_s14 = scalar_lea.vmem %s1368_s5, 2048  ;;  %s1281_s20 = smov [#allocation2]  }
  0x21   : > { %p1133_p5 = scmp.ne.s32.totalorder %s1368_s5, %s1132_s14  ;;  %s1137_s21 = sshll.u32 %s1281_s20, 4  ;;  %s1138_s21 = int_to_ptr.vmem [resolvable:$false] %s1137_s21 }
  0x22   : > { %s1139_s23 = scalar_lea.vmem %s1138_s21, 4096  ;;  %p1140_p3 = scmp.lt.s32.totalorder %s1368_s5, %s1138_s21 }
  0x23   : > { %p1135_p7 = pnand %p1133_p5, %p1625_p8  ;;  %p1141_p11 = scmp.lt.s32.totalorder %s1139_s23, %s1132_s14 }
  0x25   : > { %p1136_p9 = pneg %p1135_p7  ;;  %p1142_p12 = por %p1141_p11, %p1140_p3 }
  0x27   : > { %p1143_p13 = pnand %p1142_p12, %p1136_p9 }
  0x29   : > { %1146 = shalt.err (!%p1143_p13)
}
  0x2a   : > { %s1282_s25 = smov 128   ;;  %s1283_s26 = smov 8  }
  0x2b   : > { %1025 = dma.hbm_to_vmem [thread:$0]  (!%p1364_p6), %s1362_s29, 2048, %s1368_s5, %s1370_s7, %s1282_s25, %s1282_s25, %s1283_s26  }
  0x2c   : > { %s1399_s27 = sadd.s32 4294967295, %s1279_s18   ;;  %s798_s28 = sadd.s32 4294967294, %s1279_s18  }
  0x2d   : > { %p41_p3 = scmp.ne.s32.totalorder %s1271_s16, %s1267_s15  ;;  %p1624_p10 = scmp.eq.s32.totalorder %s1399_s27, 0 }
  0x2e   : > { %p133_p1 = scmp.eq.s32.totalorder %s1399_s27, 1  ;;  %p139_p2 = scmp.eq.s32.totalorder %s798_s28, 1 }
  0x2f   : > { %p1408_p4 = por %p1624_p10, %p41_p3  ;;  %p799_p5 = scmp.ge.s32.totalorder %s1279_s18, 1 }
  0x30   : > { %p1416_p7 = por %p133_p1, %p35_p0  ;;  %p1420_p9 = por %p139_p2, %p41_p3 }
  0x31   : > { %s1634_s30 = scalar_select %p1408_p4, 1, 0 }
  0x32   : > { %s1635_s29 = scalar_select %p1416_p7, 1, 0 }
  0x33   : > { %s1636_s5 = scalar_select %p1420_p9, 1, 0 }
  0x34   : > { %p146_p11 = scmp.lt.s32.totalorder %s1279_s18, 3  ;;  %s1284_s9 = smov [#allocation5]  }
  0x35   : > { %s158_s10 = sshll.u32 %s1284_s9, 4  ;;  %s806_s11 = sshll.u32 %s177_s24, 3  ;;  %s1429_s10 = int_to_ptr.vmem [resolvable:$true] %s158_s10 }
  0x36   : > { %p1425_p12 = pnand %p799_p5, %p146_p11  ;;  %s807_s12 = sshll.u32 %s1279_s18, 7 }
  0x37   : > { %s1445_s21 = scalar_lea.hbm %s1622_s3, %s807_s12  ;;  %s201_s23 = scalar_lea.vmem [#allocation7], %s806_s11 }
  0x38   : > { %s1637_s8 = scalar_select %p1425_p12, 1, 0 }
  0x39   : > { %p1018_p13 = pneg %p1425_p12  ;;  %s208_s25 = sshll.u32 %s201_s23, 4  ;;  %s1447_s25 = int_to_ptr.vmem [resolvable:$true] %s208_s25 }
  0x3a   : > { %s1147_s24 = scalar_lea.hbm %s1620_s1, 2048 }
  0x3b   : > { %p1438_p0 = pnand %p1018_p13, %p1624_p10  ;;  %p1148_p3 = scmp.ne.s32.totalorder %s1620_s1, %s1147_s24 }
  0x3c   : > { %p1154_p11 = scmp.lt.u32.totalorder %s1147_s24, %s1620_s1 }
  0x3d   : > { %p1149_p1 = pneg %p1438_p0 }
  0x3f   : > { %p1150_p2 = pnand %p1149_p1, %p1148_p3 }
  0x41   : > { %p1151_p5 = pneg %p1150_p2 }
  0x43   : > { %p1156_p13 = pnand %p1154_p11, %p1151_p5 }
  0x45   : > { %1159 = shalt.err (!%p1156_p13)
}
  0x46   : > { %s1160_s11 = scalar_lea.vmem %s1429_s10, 2048  ;;  %p1168_p7 = scmp.lt.s32.totalorder %s1429_s10, %s1429_s10 }
  0x47   : > { %p1161_p10 = scmp.ne.s32.totalorder %s1429_s10, %s1160_s11  ;;  %p1169_p4 = scmp.lt.s32.totalorder %s1160_s11, %s1160_s11 }
  0x49   : > { %p1163_p8 = pnand %p1161_p10, %p1149_p1  ;;  %p1170_p12 = por %p1169_p4, %p1168_p7 }
  0x4b   : > { %p1164_p9 = pneg %p1163_p8 }
  0x4d   : > { %p1171_p6 = pnand %p1170_p12, %p1164_p9 }
  0x4f   : > { %1174 = shalt.err (!%p1171_p6)
}
  0x50   : > { %s1285_s0 = smov 64   ;;  %s1286_s12 = smov 4  }
  0x51   : > { %1021 = dma.hbm_to_vmem [thread:$0]  (!%p1438_p0), %s1620_s1, 2048, %s1429_s10, [#allocation6], %s1285_s0, %s1285_s0, %s1286_s12  }
  0x52   : > { %s1175_s28 = scalar_lea.hbm %s1445_s21, 128  ;;  %p1639_p10 = scmp.ne.s32.totalorder %s1633_s6, 0 }
  0x53   : > { %p1176_p8 = scmp.ne.s32.totalorder %s1445_s21, %s1175_s28  ;;  %s1180_s14 = scalar_lea.hbm %s1622_s3, 256 }
  0x54   : > { %p1640_p4 = pneg %p1639_p10  ;;  %p1181_p9 = scmp.lt.u32.totalorder %s1445_s21, %s1622_s3 }
  0x55   : > { %p1182_p12 = scmp.lt.u32.totalorder %s1180_s14, %s1175_s28  ;;  %p1184_p1 = scmp.lt.u32.totalorder %s1175_s28, %s1445_s21 }
  0x56   : > { %p1178_p7 = pnand %p1176_p8, %p1640_p4 }
  0x57   : > { %p1183_p3 = por %p1182_p12, %p1181_p9 }
  0x58   : > { %p1179_p6 = pneg %p1178_p7 }
  0x59   : > { %p1185_p2 = por %p1184_p1, %p1183_p3 }
  0x5b   : > { %p1186_p5 = pnand %p1185_p2, %p1179_p6 }
  0x5d   : > { %1189 = shalt.err (!%p1186_p5)
}
  0x5e   : > { %s1190_s10 = scalar_lea.vmem %s1447_s25, 128  ;;  %p1641_p11 = pmov %p1640_p4 }
  0x5f   : > { %p1191_p0 = scmp.ne.s32.totalorder %s1447_s25, %s1190_s10  ;;  %s1287_s13 = smov [#allocation7]  }
  0x60   : > { %s1195_s0 = sshll.u32 %s1287_s13, 4  ;;  %s1196_s0 = int_to_ptr.vmem [resolvable:$false] %s1195_s0 }
  0x61   : > { %p1193_p13 = pnand %p1191_p0, %p1641_p11  ;;  %s1197_s12 = scalar_lea.vmem %s1196_s0, 256 }
  0x62   : > { %p1198_p4 = scmp.lt.s32.totalorder %s1447_s25, %s1196_s0  ;;  %p1199_p7 = scmp.lt.s32.totalorder %s1197_s12, %s1190_s10 }
  0x63   : > { %p1194_p8 = pneg %p1193_p13 }
  0x64   : > { %p1200_p9 = por %p1199_p7, %p1198_p4 }
  0x66   : > { %p1201_p12 = pnand %p1200_p9, %p1194_p8 }
  0x68   : > { %1204 = shalt.err (!%p1201_p12)
}
  0x69   : > { %1028 = dma.hbm_to_vmem [thread:$0]  (!%p1639_p10), %s1445_s21, 128, %s1447_s25, %s1370_s7  }
  0x6a   : > { %p1642_p6 = scmp.ne.s32.totalorder %s1637_s8, 0 }
  0x6b   : > { %s219_s23 = sand.u32 (!%p1642_p6), 1, %s1399_s27   ;;  %s1498_s26 = sand.u32 (!%p1642_p6), 1, %s1271_s16  }
  0x6c   : > { %217 = sbr.rel (%p1642_p6) target bundleno = 647 (0x287), region = 36  ;;  %s809_s28 = sshll.u32 (!%p1642_p6), %s1498_s26, 7 }
  0x6d   : > { %s220_s24 = scalar_lea.sflag (!%p1642_p6), [#allocation3], %s219_s23  ;;  %s1501_s9 = scalar_lea.vmem (!%p1642_p6), [#allocation2], %s809_s28 }
  0x6e   : > { %p1643_p3 = scmp.ne.s32.totalorder (!%p1642_p6), %s1634_s30, 0 }
  0x73   : > { %1250 = dma.done.wait (%p1643_p3), %s220_s24, 2048  }
  0x74   : > { %1252 = vsyncadd (%p1643_p3), %s220_s24, 4294965248  ;;  %p1644_p10 = scmp.eq.s32.totalorder %s1399_s27, 0 }
  0x76   : > { %1254 = dma.done.wait (%p1644_p10), [#allocation6], 2048   ;;  %p1645_p1 = pmov %p1644_p10 }
  0x77   : > { %s811_s6 = sshll.u32 %s1498_s26, 3 }
  0x78   : > { %1256 = vsyncadd (%p1645_p1), [#allocation6], 4294965248  ;;  %s1514_s7 = scalar_lea.vmem [#allocation7], %s811_s6 }
  0x79   : > { %1258 = dma.done.wait (%p1643_p3), %s220_s24, 128  }
  0x7a   : > { %1260 = vsyncadd (%p1643_p3), %s220_s24, 4294967168  ;;  %v1077_v0 = vld [vmem:[#allocation5 + $0x40] sm:$0xff]   ;;  %v1079_v2 = vld [vmem:[#allocation5 + $0x48] sm:$0xff]   ;;  %v1288_v32 = vmov 0.0|0.0   ;;  %vm1289_vm0 = vmmov 0   ;;  %v1290_v33 = vmov 0.0  }
  0x7b   : > { %v1078_v1 = vld [vmem:[#allocation5] sm:$0xff]   ;;  %852 = vmatprep.subr.bf16.mxu0 %v1077_v0  ;;  %992 = vmatprep.subr.bf16.mxu1 %v1077_v0  ;;  %v1080_v3 = vld [vmem:[#allocation5 + $0x8] sm:$0xff]   ;;  %v1081_v4 = vld [vmem:[#allocation5 + $0x50] sm:$0xff]   ;;  %s265_s21 = scalar_lea.vmem [#allocation8], %s811_s6  ;;  %s847_s14 = sshll.u32 %s1399_s27, 7 }
  0x7c   : > { %853 = vmatpush3.bf16.msra.mxu0 %v1078_v1  ;;  %1000 = vmatpush3.bf16.msra.mxu1 %v1078_v1  ;;  %v1082_v5 = vld [vmem:[#allocation5 + $0x10] sm:$0xff]   ;;  %v1083_v6 = vld [vmem:[#allocation5 + $0x58] sm:$0xff]   ;;  %v1085_v8 = vld [vmem:[#allocation5 + $0x60] sm:$0xff]   ;;  %s698_s25 = sshll.u32 %s265_s21, 4  ;;  %s1577_s10 = scalar_lea.hbm %s1623_s4, %s847_s14  ;;  %s1572_s25 = int_to_ptr.vmem [resolvable:$true] %s698_s25 }
  0x7d   : > { %854 = vmatprep.subr.bf16.mxu0 %v1079_v2  ;;  %993 = vmatprep.subr.bf16.mxu1 %v1079_v2  ;;  %v1084_v7 = vld [vmem:[#allocation5 + $0x18] sm:$0xff]   ;;  %v1086_v9 = vld [vmem:[#allocation5 + $0x20] sm:$0xff]   ;;  %v1087_v10 = vld [vmem:[#allocation5 + $0x68] sm:$0xff]   ;;  %s685_s13 = scalar_lea.sflag [#allocation4], %s1498_s26  ;;  %s1205_s0 = scalar_lea.vmem %s1572_s25, 128 }
  0x7e   : > { %v1095_v11 = vld [vmem:[%s1501_s9 + $0x4] ss:$8 sps:$4 sm:$0xff]   ;;  %v1089_v14 = vld [vmem:[#allocation5 + $0x70] sm:$0xff]   ;;  %v1091_v16 = vld [vmem:[#allocation5 + $0x78] sm:$0xff]   ;;  %p1206_p2 = scmp.ne.s32.totalorder %s1572_s25, %s1205_s0  ;;  %p1646_p5 = scmp.ne.s32.totalorder %s1635_s29, 0 }
  0x7f   : > { %v1088_v12 = vld [vmem:[#allocation5 + $0x28] sm:$0xff]   ;;  %531 = vmatprep.mubr.bf16.mxu0 %v1095_v11  ;;  %v1090_v15 = vld [vmem:[#allocation5 + $0x30] sm:$0xff]   ;;  %v1092_v17 = vld [vmem:[#allocation5 + $0x38] sm:$0xff]   ;;  %s1291_s27 = smov [#allocation8]  }
  0x80   : > { %855 = vmatpush3.bf16.msra.mxu0 %v1080_v3  ;;  %1001 = vmatpush3.bf16.msra.mxu1 %v1080_v3  ;;  %v1101_v13 = vld [vmem:[%s1501_s9 + $0x44] ss:$8 sps:$4 sm:$0xff]   ;;  %v1093_v18 = vld [vmem:[%s1501_s9] ss:$8 sps:$4 sm:$0xff]   ;;  %v1096_v20 = vld [vmem:[%s1501_s9 + $0x14] ss:$8 sps:$4 sm:$0xff]   ;;  %p1207_p0 = pnand %p1206_p2, %p1646_p5 }
  0x81   : > { %856 = vmatprep.subr.bf16.mxu0 %v1081_v4  ;;  %994 = vmatprep.subr.bf16.mxu1 %v1081_v4  ;;  %v1099_v19 = vld [vmem:[%s1501_s9 + $0x40] ss:$8 sps:$4 sm:$0xff]   ;;  %v1105_v21 = vld [vmem:[%s1501_s9 + $0x54] ss:$8 sps:$4 sm:$0xff]   ;;  %v1098_v22 = vld [vmem:[%s1501_s9 + $0x10] ss:$8 sps:$4 sm:$0xff]  }
  0x82   : > { %563 = vmatprep.mubr.bf16.mxu1 %v1101_v13  ;;  %v1107_v23 = vld [vmem:[%s1501_s9 + $0x50] ss:$8 sps:$4 sm:$0xff]   ;;  %v1102_v24 = vld [vmem:[%s1501_s9 + $0x24] ss:$8 sps:$4 sm:$0xff]   ;;  %v1104_v26 = vld [vmem:[%s1501_s9 + $0x20] ss:$8 sps:$4 sm:$0xff]   ;;  %p1208_p11 = pneg %p1207_p0 }
  0x83   : > { %v1111_v25 = vld [vmem:[%s1501_s9 + $0x64] ss:$8 sps:$4 sm:$0xff]   ;;  %v1113_v27 = vld [vmem:[%s1501_s9 + $0x60] ss:$8 sps:$4 sm:$0xff]   ;;  %v1108_v28 = vld [vmem:[%s1501_s9 + $0x34] ss:$8 sps:$4 sm:$0xff]  }
  0x84   : > { %857 = vmatpush3.bf16.msra.mxu0 %v1082_v5  ;;  %1002 = vmatpush3.bf16.msra.mxu1 %v1082_v5  ;;  %v1114_v29 = vld [vmem:[%s1501_s9 + $0x74] ss:$8 sps:$4 sm:$0xff]   ;;  %v1110_v30 = vld [vmem:[%s1501_s9 + $0x30] ss:$8 sps:$4 sm:$0xff]   ;;  %v1540_v36 = vld [vmem:[%s1621_s2] ss:$0 sm:$0xff] }
  0x85   : > { %858 = vmatprep.subr.bf16.mxu0 %v1083_v6  ;;  %995 = vmatprep.subr.bf16.mxu1 %v1083_v6  ;;  %v1116_v31 = vld [vmem:[%s1501_s9 + $0x70] ss:$8 sps:$4 sm:$0xff]   ;;  %s1209_s12 = sshll.u32 %s1291_s27, 4  ;;  %s1210_s12 = int_to_ptr.vmem [resolvable:$false] %s1209_s12 }
  0x86   : > { %s1211_s23 = scalar_lea.vmem %s1210_s12, 256  ;;  %p1212_p13 = scmp.lt.s32.totalorder %s1572_s25, %s1210_s12 }
  0x87   : > { %p1213_p8 = scmp.lt.s32.totalorder %s1211_s23, %s1205_s0 }
  0x88   : > { %859 = vmatpush3.bf16.msra.mxu0 %v1084_v7  ;;  %1003 = vmatpush3.bf16.msra.mxu1 %v1084_v7 }
  0x89   : > { %860 = vmatprep.subr.bf16.mxu0 %v1085_v8  ;;  %996 = vmatprep.subr.bf16.mxu1 %v1085_v8  ;;  %p1214_p4 = por %p1213_p8, %p1212_p13 }
  0x8b   : > { %p1215_p7 = pnand %p1214_p4, %p1208_p11 }
  0x8c   : > { %861 = vmatpush3.bf16.msra.mxu0 %v1086_v9  ;;  %1004 = vmatpush3.bf16.msra.mxu1 %v1086_v9 }
  0x8d   : > { %862 = vmatprep.subr.bf16.mxu0 %v1087_v10  ;;  %997 = vmatprep.subr.bf16.mxu1 %v1087_v10 }
  0x90   : > { %863 = vmatpush3.bf16.msra.mxu0 %v1088_v12  ;;  %1005 = vmatpush3.bf16.msra.mxu1 %v1088_v12 }
  0x91   : > { %864 = vmatprep.subr.bf16.mxu0 %v1089_v14  ;;  %998 = vmatprep.subr.bf16.mxu1 %v1089_v14 }
  0x94   : > { %865 = vmatpush3.bf16.msra.mxu0 %v1090_v15  ;;  %1006 = vmatpush3.bf16.msra.mxu1 %v1090_v15 }
  0x95   : > { %866 = vmatprep.subr.bf16.mxu0 %v1091_v16  ;;  %999 = vmatprep.subr.bf16.mxu1 %v1091_v16 }
  0x98   : > { %867 = vmatpush3.bf16.msra.mxu0 %v1092_v17  ;;  %1007 = vmatpush3.bf16.msra.mxu1 %v1092_v17 }
  0x99   : > { %968 = vmatprep.subr.bf16.mxu1 %v1288_v32 }
  0x9b   : > { %532 = vmatmul.mubr.bf16.vlgmr.msra.gmra.mrb[0].mxu0 %v1093_v18  ;;  %564 = vmatmul.mubr.bf16.vlgmr.msra.gmra.mrb[0].mxu1 %v1099_v19 }
  0x9c   : > { %539 = vmatprep.mubr.bf16.mxu0 %v1096_v20  ;;  %571 = vmatprep.mubr.bf16.mxu1 %v1105_v21 }
  0xa3   : > { %540 = vmatmul.mubr.bf16.gmra.mrb[4].mxu0 %v1098_v22  ;;  %572 = vmatmul.mubr.bf16.gmra.mrb[4].mxu1 %v1107_v23 }
  0xa4   : > { %547 = vmatprep.mubr.bf16.mxu0 %v1102_v24  ;;  %579 = vmatprep.mubr.bf16.mxu1 %v1111_v25 }
  0xab   : > { %548 = vmatmul.mubr.bf16.gmra.mrb[8].mxu0 %v1104_v26  ;;  %580 = vmatmul.mubr.bf16.gmra.mrb[8].mxu1 %v1113_v27 }
  0xac   : > { %555 = vmatprep.mubr.bf16.mxu0 %v1108_v28  ;;  %587 = vmatprep.mubr.bf16.mxu1 %v1114_v29 }
  0xb3   : > { %556 = vmatmul.mubr.bf16.gmra.mrb[12].mxu0 %v1110_v30  ;;  %588 = vmatmul.mubr.bf16.gmra.mrb[12].mxu1 %v1116_v31 }
  0xb4   : > { %965 = vmatprep.mubr.msk.f32.mxu1 %vm1289_vm0, %v1290_v33 }
 0x16e   : > { %v868_v34 = vpop.f32.mrb[0].mxu0  ;;  %v892_v35 = vpop.f32.mrb[0].mxu1 }
 0x16f   : > { %v869_v37 = vpop.f32.mrb[1].mxu0  ;;  %v893_v38 = vpop.f32.mrb[1].mxu1 }
 0x170   : > { %v870_v39 = vadd.f32 %v869_v37, %v868_v34  ;;  %v871_v40 = vpop.f32.mrb[2].mxu0  ;;  %v894_v41 = vadd.f32 %v893_v38, %v892_v35  ;;  %v895_v42 = vpop.f32.mrb[2].mxu1 }
 0x171   : > { %v872_v43 = vpop.f32.mrb[3].mxu0  ;;  %v896_v44 = vpop.f32.mrb[3].mxu1 }
 0x172   : > { %v534_v45 = vadd.f32 %v870_v39, %v1540_v36  ;;  %v873_v46 = vadd.f32 %v872_v43, %v871_v40  ;;  %v566_v47 = vadd.f32 %v894_v41, %v1540_v36  ;;  %v897_v48 = vadd.f32 %v896_v44, %v895_v42 }
 0x174   : > { %v537_v49 = vadd.f32 %v873_v46, %v1540_v36  ;;  %v604_v50 = vmax.f32 %v566_v47, 0.0  ;;  %v569_v51 = vadd.f32 %v897_v48, %v1540_v36  ;;  %v596_v52 = vmax.f32 %v534_v45, 0.0 }
 0x176   : > { %v597_v53 = vmax.f32 %v537_v49, 0.0  ;;  %v874_v54 = vpop.f32.mrb[4].mxu0  ;;  %v605_v55 = vmax.f32 %v569_v51, 0.0  ;;  %v898_v56 = vpop.f32.mrb[4].mxu1 }
 0x177   : > { %v875_v57 = vpop.f32.mrb[5].mxu0  ;;  %v899_v58 = vpop.f32.mrb[5].mxu1 }
 0x178   : > { %v969_v59 = vpack.c.bf16 %v597_v53, %v596_v52  ;;  %v876_v60 = vadd.f32 %v875_v57, %v874_v54  ;;  %v877_v61 = vpop.f32.mrb[6].mxu0  ;;  %v1546_v62 = vpack.c.bf16 %v605_v55, %v604_v50  ;;  %v900_v63 = vadd.f32 %v899_v58, %v898_v56  ;;  %v901_v0 = vpop.f32.mrb[6].mxu1 }
 0x179   : > { %v878_v1 = vpop.f32.mrb[7].mxu0  ;;  %v902_v2 = vpop.f32.mrb[7].mxu1 }
 0x17a   : > { %v542_v3 = vadd.f32 %v876_v60, %v1540_v36  ;;  %v879_v4 = vadd.f32 %v878_v1, %v877_v61  ;;  %970 = vmatpush3.bf16.msra.mxu1 %v969_v59  ;;  %v574_v5 = vadd.f32 %v900_v63, %v1540_v36  ;;  %v903_v6 = vadd.f32 %v902_v2, %v901_v0 }
 0x17b   : > { %971 = vmatprep.subr.bf16.mxu1 %v1288_v32 }
 0x17c   : > { %v545_v7 = vadd.f32 %v879_v4, %v1540_v36  ;;  %v606_v8 = vmax.f32 %v574_v5, 0.0  ;;  %v577_v9 = vadd.f32 %v903_v6, %v1540_v36  ;;  %v598_v10 = vmax.f32 %v542_v3, 0.0 }
 0x17e   : > { %v599_v11 = vmax.f32 %v545_v7, 0.0  ;;  %v880_v12 = vpop.f32.mrb[8].mxu0  ;;  %v607_v13 = vmax.f32 %v577_v9, 0.0  ;;  %v904_v14 = vpop.f32.mrb[8].mxu1 }
 0x17f   : > { %v881_v15 = vpop.f32.mrb[9].mxu0  ;;  %v905_v16 = vpop.f32.mrb[9].mxu1 }
 0x180   : > { %v972_v17 = vpack.c.bf16 %v599_v11, %v598_v10  ;;  %v882_v18 = vadd.f32 %v881_v15, %v880_v12  ;;  %v883_v19 = vpop.f32.mrb[10].mxu0  ;;  %v984_v20 = vpack.c.bf16 %v607_v13, %v606_v8  ;;  %v906_v21 = vadd.f32 %v905_v16, %v904_v14  ;;  %v907_v22 = vpop.f32.mrb[10].mxu1 }
 0x181   : > { %v884_v23 = vpop.f32.mrb[11].mxu0  ;;  %v908_v24 = vpop.f32.mrb[11].mxu1 }
 0x182   : > { %v550_v25 = vadd.f32 %v882_v18, %v1540_v36  ;;  %v885_v26 = vadd.f32 %v884_v23, %v883_v19  ;;  %973 = vmatpush3.bf16.msra.mxu1 %v972_v17  ;;  %v582_v27 = vadd.f32 %v906_v21, %v1540_v36  ;;  %v909_v28 = vadd.f32 %v908_v24, %v907_v22 }
 0x183   : > { %974 = vmatprep.subr.bf16.mxu1 %v1288_v32 }
 0x184   : > { %v553_v29 = vadd.f32 %v885_v26, %v1540_v36  ;;  %v608_v30 = vmax.f32 %v582_v27, 0.0  ;;  %v585_v31 = vadd.f32 %v909_v28, %v1540_v36  ;;  %v600_v33 = vmax.f32 %v550_v25, 0.0 }
 0x186   : > { %v601_v34 = vmax.f32 %v553_v29, 0.0  ;;  %v886_v35 = vpop.f32.mrb[12].mxu0  ;;  %v609_v37 = vmax.f32 %v585_v31, 0.0  ;;  %v910_v38 = vpop.f32.mrb[12].mxu1 }
 0x187   : > { %v887_v39 = vpop.f32.mrb[13].mxu0  ;;  %v911_v40 = vpop.f32.mrb[13].mxu1 }
 0x188   : > { %v975_v41 = vpack.c.bf16 %v601_v34, %v600_v33  ;;  %v888_v42 = vadd.f32 %v887_v39, %v886_v35  ;;  %v889_v43 = vpop.f32.mrb[14].mxu0  ;;  %v987_v44 = vpack.c.bf16 %v609_v37, %v608_v30  ;;  %v912_v45 = vadd.f32 %v911_v40, %v910_v38  ;;  %v913_v46 = vpop.f32.mrb[14].mxu1 }
 0x189   : > { %v890_v47 = vpop.f32.mrb[15].mxu0  ;;  %v914_v48 = vpop.f32.mrb[15].mxu1 }
 0x18a   : > { %v558_v49 = vadd.f32 %v888_v42, %v1540_v36  ;;  %v891_v50 = vadd.f32 %v890_v47, %v889_v43  ;;  %976 = vmatpush3.bf16.msra.mxu1 %v975_v41  ;;  %v590_v51 = vadd.f32 %v912_v45, %v1540_v36  ;;  %v915_v52 = vadd.f32 %v914_v48, %v913_v46 }
 0x18b   : > { %977 = vmatprep.subr.bf16.mxu1 %v1288_v32 }
 0x18c   : > { %v561_v53 = vadd.f32 %v891_v50, %v1540_v36  ;;  %v610_v54 = vmax.f32 %v590_v51, 0.0  ;;  %v593_v55 = vadd.f32 %v915_v52, %v1540_v36  ;;  %v602_v56 = vmax.f32 %v558_v49, 0.0  ;;  %v612_v36 = vld [vmem:[%s1514_s7] sm:$0xff] }
 0x18e   : > { %v603_v57 = vmax.f32 %v561_v53, 0.0  ;;  %v611_v58 = vmax.f32 %v593_v55, 0.0 }
 0x190   : > { %v978_v59 = vpack.c.bf16 %v603_v57, %v602_v56  ;;  %v990_v60 = vpack.c.bf16 %v611_v58, %v610_v54 }
 0x192   : > { %979 = vmatpush3.bf16.msra.mxu1 %v978_v59 }
 0x193   : > { %980 = vmatprep.subr.bf16.mxu1 %v1288_v32 }
 0x196   : > { %982 = vmatpush3.bf16.msra.mxu1 %v1546_v62 }
 0x197   : > { %983 = vmatprep.subr.bf16.mxu1 %v1288_v32 }
 0x19a   : > { %985 = vmatpush3.bf16.msra.mxu1 %v984_v20 }
 0x19b   : > { %986 = vmatprep.subr.bf16.mxu1 %v1288_v32 }
 0x19e   : > { %988 = vmatpush3.bf16.msra.mxu1 %v987_v44 }
 0x19f   : > { %989 = vmatprep.subr.bf16.mxu1 %v1288_v32 }
 0x1a2   : > { %991 = vmatpush3.bf16.msra.mxu1 %v990_v60 }
 0x1a5   : > { %966 = vmatmul.mubr.f32.vlgmr.msra.gmra.mrb[16].mxu1 %v612_v36 }
 0x278   : > { %v679_v61 = vpop.f32.mrb[16].mxu1 }
 0x279   : > { %683 = vst [vmem:[%s265_s21] sm:$0xff] %v679_v61  ;;  %v967_v32 = vpop.f32.mrb[17].mxu1 }
 0x27a   : > { %1218 = shalt.err (!%p1215_p7)
}
 0x27b   : > { %s1219_s26 = scalar_lea.hbm %s1577_s10, 128  ;;  %s1223_s9 = scalar_lea.hbm %s1623_s4, 256 }
 0x27c   : > { %p1220_p9 = scmp.ne.s32.totalorder %s1577_s10, %s1219_s26  ;;  %p1224_p3 = scmp.lt.u32.totalorder %s1577_s10, %s1623_s4 }
 0x27d   : > { %p1225_p10 = scmp.lt.u32.totalorder %s1223_s9, %s1219_s26  ;;  %p1227_p2 = scmp.lt.u32.totalorder %s1219_s26, %s1577_s10 }
 0x27e   : > { %p1221_p12 = pnand %p1220_p9, %p1646_p5 }
 0x27f   : > { %p1226_p1 = por %p1225_p10, %p1224_p3 }
 0x280   : > { %p1222_p6 = pneg %p1221_p12 }
 0x281   : > { %p1228_p0 = por %p1227_p2, %p1226_p1 }
 0x283   : > { %p1229_p11 = pnand %p1228_p0, %p1222_p6 }
 0x285   : > { %1232 = shalt.err (!%p1229_p11)
}
 0x286   : > { %1016 = dma.vmem_to_hbm [thread:$0]  (%p1646_p5), %s1572_s25, 128, %s1577_s10, %s685_s13  }
 0x287 PF: > { %s710_s30 = sand.u32 1, %s1267_s15   ;;  %p1647_p13 = scmp.ne.s32.totalorder %s1636_s5, 0 }
 0x288   : > { %p1648_p8 = scmp.ge.s32.totalorder %s1279_s18, 2  ;;  %s711_s8 = scalar_lea.sflag [#allocation4], %s710_s30 }
 0x28a   : > { %p1030_p4 = pnand %p1648_p8, %p1647_p13 }
 0x28c   : > { %1262 = dma.done.wait (!%p1030_p4), %s711_s8, 128  }
 0x28d   : > { %1264 = vsyncadd (!%p1030_p4), %s711_s8, 4294967168  ;;  %p18_p7 = scmp.ge.s32.totalorder %s1338_s19, 4   ;;  %s1649_s15 = smov %s1271_s16 }
 0x28e   : > { %s1650_s16 = smov %s1275_s17  ;;  %s1651_s17 = smov %s1349_s22 }
 0x28f   : > { %s1652_s18 = smov %s1338_s19  ;;  %20 = sbr.rel (!%p18_p7) target bundleno = 8 (0x8), region = 96 }
 0x296   :  { %716 = vsyncpa [#allocation3], 1 }
 0x297   :  { %718 = vsyncpa [#allocation3 + $0x1], 1 }
 0x298   :  { %719 = vsyncpa [#allocation6], 1 }
 0x299   :  { %720 = vsyncpa [#allocation4], 1 }
 0x29a   :  { %722 = vsyncpa [#allocation4 + $0x1], 1 }

</bundles_post_ra>
